<compile_context>
chip_gen: v7x
topology: tpu7x:2x2x1
jax: 0.10.0
libtpu: 0.0.40
codegen_flags: <defaults>
</compile_context>

<pallas_src>
import jax
import jax.numpy as jnp
from jax.experimental import pallas as pl
from jax.experimental.pallas import tpu as pltpu

_SUBLANE = 8
_TARGET_BLOCK_BYTES = 2 * 1024 * 1024      # VMEM cast-kernel block size (~2 MiB)
_MIN_KERNEL_BYTES = 1 * 1024 * 1024        # below this, let XLA do the convert
_MAX_DMA_CHUNKS = 8                        # in-flight HBM->HBM DMAs for the copy path
_MIN_DMA_CHUNK_BYTES = 512 * 1024


# --------------------------------------------------------------------------
# Path 1: fresh-buffer identity copy, dtype preserved: direct HBM->HBM DMA.
# --------------------------------------------------------------------------
def _row_chunks(extent: int, nchunks: int):
    """Partition [0, extent) into <= nchunks contiguous (start, size) chunks."""
    base = pl.cdiv(extent, nchunks)
    chunks = []
    start = 0
    while start < extent:
        size = min(base, extent - start)
        chunks.append((start, size))
        start += size
    return chunks


def _dma_copy(x: jax.Array) -> jax.Array:
    """Identity copy into a fresh buffer via chunked HBM->HBM DMA (no VMEM)."""
    orig_shape = x.shape
    n = x.size
    itemsize = jnp.dtype(x.dtype).itemsize
    total_bytes = n * itemsize

    # Lane-dense 2D view when the flat size allows it (free reshape of a
    # contiguous array); otherwise a flat 1D view.  DMA has no (8,128)
    # layout requirement in HBM, this is just a convenient chunking axis.
    lanes = next((c for c in (1024, 512, 256, 128) if n % c == 0), None)
    work = x.reshape(n // lanes, lanes) if lanes is not None else x.reshape(n)
    extent = work.shape[0]

    nchunks = max(1, min(_MAX_DMA_CHUNKS, total_bytes // _MIN_DMA_CHUNK_BYTES, extent))
    chunks = _row_chunks(extent, nchunks)

    def kernel(x_hbm, o_hbm, sems):
        def desc(idx):
            start, size = chunks[idx]
            return pltpu.make_async_copy(
                x_hbm.at[pl.ds(start, size)],
                o_hbm.at[pl.ds(start, size)],
                sems.at[idx],
            )

        # Issue all chunk DMAs (multiple in flight), then wait for all.
        for i in range(len(chunks)):
            desc(i).start()
        for i in range(len(chunks)):
            desc(i).wait()

    out = pl.pallas_call(
        kernel,
        out_shape=jax.ShapeDtypeStruct(work.shape, work.dtype),
        in_specs=[pl.BlockSpec(memory_space=pl.ANY)],
        out_specs=pl.BlockSpec(memory_space=pl.ANY),
        scratch_shapes=[pltpu.SemaphoreType.DMA((len(chunks),))],
    )(work)
    return out.reshape(orig_shape)


# --------------------------------------------------------------------------
# Path 2: int/bool -> float32 cast on large, lane-aligned inputs: VMEM
# BlockSpec-pipelined kernel (needs the VPU for the convert).
# --------------------------------------------------------------------------
def _cast_kernel(x_ref, o_ref):
    o_ref[...] = x_ref[...].astype(o_ref.dtype)


def _cast_2d(x: jax.Array, out_dtype) -> jax.Array:
    n = x.size
    lanes = next(c for c in (1024, 512, 256, 128) if n % c == 0)
    rows = n // lanes
    x2d = x.reshape(rows, lanes)

    in_item = jnp.dtype(x.dtype).itemsize
    out_item = jnp.dtype(out_dtype).itemsize
    itemsize = max(in_item, out_item)
    # Packed sub-32-bit inputs want their sublane multiple (16 for 2-byte,
    # 32 for 1-byte dtypes).
    sub = max(_SUBLANE, 32 // max(1, min(in_item, 4)))

    tr = (_TARGET_BLOCK_BYTES // (lanes * itemsize)) // sub * sub
    tr = max(tr, sub)
    if tr >= rows:
        tr = rows  # full-extent dims are exempt from the (8,128) rule
    grid = (pl.cdiv(rows, tr),)  # ragged last block is masked by Pallas

    out2d = pl.pallas_call(
        _cast_kernel,
        out_shape=jax.ShapeDtypeStruct((rows, lanes), out_dtype),
        grid_spec=pltpu.PrefetchScalarGridSpec(
            num_scalar_prefetch=0,
            grid=grid,
            in_specs=[pl.BlockSpec((tr, lanes), lambda i: (i, 0))],
            out_specs=pl.BlockSpec((tr, lanes), lambda i: (i, 0)),
        ),
        compiler_params=pltpu.CompilerParams(
            dimension_semantics=("parallel",),
            vmem_limit_bytes=32 * 1024 * 1024,
        ),
    )(x2d)
    return out2d.reshape(x.shape)


# --------------------------------------------------------------------------
# Public wrapper (PyTorch `identical_map.forward` equivalent).
# --------------------------------------------------------------------------
def identical_map(x: jax.Array, *, force_copy: bool = False) -> jax.Array:
    """Pallas equivalent of PyTorch `identical_map.forward` (x * 1.0).

    force_copy=True materializes a fresh output buffer through the Pallas
    kernel even when a zero-cost path would be semantically sufficient.
    """
    in_dtype = jnp.dtype(x.dtype)
    # PyTorch `x * 1.0` keeps float/complex dtypes, promotes int/bool to float.
    out_dtype = in_dtype if jnp.issubdtype(in_dtype, jnp.inexact) else jnp.dtype(jnp.float32)
    needs_cast = out_dtype != in_dtype

    if x.size == 0:
        return x.astype(out_dtype)

    # Pallas TPU cannot lower complex loads/stores; x * 1.0 is identity there.
    if jnp.issubdtype(in_dtype, jnp.complexfloating):
        return x

    if not needs_cast:
        if not force_copy:
            # Pure identity: no copy is semantically required in JAX.
            return x
        return _dma_copy(x)

    # int/bool -> float32 promotion.
    out_bytes = x.size * jnp.dtype(out_dtype).itemsize
    if (not force_copy and out_bytes < _MIN_KERNEL_BYTES) or (x.size % 128 != 0):
        # Small or ragged: single XLA convert pass (no pad/slice round trips).
        return x.astype(out_dtype)
    return _cast_2d(x, out_dtype)


if __name__ == "__main__":
    key = jax.random.PRNGKey(0)

    # Primary case: small NCHW input (batch=2, channels=4, spatial=16x16).
    x = jax.random.normal(key, (2, 4, 16, 16), dtype=jnp.float32)
    y = jax.block_until_ready(identical_map(x))                      # fast path
    assert y.shape == x.shape and y.dtype == x.dtype
    assert jnp.array_equal(y, x), "identical_map mismatch (fast path)"

    y_k = jax.block_until_ready(identical_map(x, force_copy=True))   # DMA-copy kernel
    assert y_k.shape == x.shape and y_k.dtype == x.dtype
    assert jnp.array_equal(y_k, x), "identical_map mismatch (DMA copy, small)"

    # Multi-chunk HBM->HBM DMA path (several in-flight chunk DMAs).
    x_big = jax.random.normal(key, (8, 128, 1280), dtype=jnp.float32)
    y_big = jax.block_until_ready(identical_map(x_big, force_copy=True))
    assert jnp.array_equal(y_big, x_big), "identical_map mismatch (DMA copy, chunked)"

    # Ragged flat size (not a multiple of 128): 1-D DMA path, no padding.
    x_odd = jax.random.normal(key, (2, 3, 7, 5), dtype=jnp.float32)
    y_odd = jax.block_until_ready(identical_map(x_odd, force_copy=True))
    assert jnp.array_equal(y_odd, x_odd), "identical_map mismatch (DMA copy, ragged)"

    # int -> float32 promotion through the VMEM pipelined cast kernel.
    x_int = jax.random.randint(key, (256, 2048), 0, 100, dtype=jnp.int32)
    y_int = jax.block_until_ready(identical_map(x_int))
    assert y_int.dtype == jnp.float32
    assert jnp.array_equal(y_int, x_int.astype(jnp.float32)), "cast-kernel mismatch"

    # Small / ragged bool promotion: XLA single-pass convert (no kernel).
    x_bool = jax.random.bernoulli(key, 0.5, (3, 5, 7))
    y_bool = jax.block_until_ready(identical_map(x_bool))
    assert y_bool.dtype == jnp.float32
    assert jnp.array_equal(y_bool, x_bool.astype(jnp.float32)), "bool promote mismatch"

    # Under jit as well (common usage).
    y_jit = jax.block_until_ready(
        jax.jit(lambda a: identical_map(a, force_copy=True))(x_big)
    )
    assert jnp.array_equal(y_jit, x_big), "identical_map mismatch (jit path)"

    print("KERNEL_OK")
</pallas_src>

<mosaic_0001>
module attributes {stable_mosaic.version = 11 : i64} {
  func.func @kernel(%arg0: memref<2x1024xf32, #tpu.memory_space<any>>, %arg1: memref<2x1024xf32, #tpu.memory_space<any>>, %arg2: memref<1x!tpu.dma_semaphore, #tpu.memory_space<semaphore_mem>>) attributes {dimension_semantics = [], scalar_prefetch = 0 : i64, scratch_operands = 1 : i64, tpu.core_type = #tpu.core_type<tc>} {
    %c0_i32 = arith.constant 0 : i32
    %c0_i32_0 = arith.constant 0 : i32
    %c0_i32_1 = arith.constant 0 : i32
    %0 = tpu.memref_slice %arg0[%c0_i32_0, %c0_i32_1] : memref<2x1024xf32, #tpu.memory_space<any>> -> memref<2x1024xf32, #tpu.memory_space<any>>
    %c0_i32_2 = arith.constant 0 : i32
    %c0_i32_3 = arith.constant 0 : i32
    %1 = tpu.memref_slice %arg1[%c0_i32_2, %c0_i32_3] : memref<2x1024xf32, #tpu.memory_space<any>> -> memref<2x1024xf32, #tpu.memory_space<any>>
    %2 = tpu.memref_slice %arg2[%c0_i32] : memref<1x!tpu.dma_semaphore, #tpu.memory_space<semaphore_mem>> -> memref<1x!tpu.dma_semaphore, #tpu.memory_space<semaphore_mem>>
    %3 = tpu.memref_squeeze %2 : memref<1x!tpu.dma_semaphore, #tpu.memory_space<semaphore_mem>> -> memref<!tpu.dma_semaphore, #tpu.memory_space<semaphore_mem>>
    tpu.enqueue_dma source(%0 : memref<2x1024xf32, #tpu.memory_space<any>>) target(%1 : memref<2x1024xf32, #tpu.memory_space<any>>) target_semaphore(%3 : memref<!tpu.dma_semaphore, #tpu.memory_space<semaphore_mem>>)
    %c0_i32_4 = arith.constant 0 : i32
    %c0_i32_5 = arith.constant 0 : i32
    %c0_i32_6 = arith.constant 0 : i32
    %4 = tpu.memref_slice %arg0[%c0_i32_5, %c0_i32_6] : memref<2x1024xf32, #tpu.memory_space<any>> -> memref<2x1024xf32, #tpu.memory_space<any>>
    %c0_i32_7 = arith.constant 0 : i32
    %c0_i32_8 = arith.constant 0 : i32
    %5 = tpu.memref_slice %arg1[%c0_i32_7, %c0_i32_8] : memref<2x1024xf32, #tpu.memory_space<any>> -> memref<2x1024xf32, #tpu.memory_space<any>>
    %6 = tpu.memref_slice %arg2[%c0_i32_4] : memref<1x!tpu.dma_semaphore, #tpu.memory_space<semaphore_mem>> -> memref<1x!tpu.dma_semaphore, #tpu.memory_space<semaphore_mem>>
    %7 = tpu.memref_squeeze %6 : memref<1x!tpu.dma_semaphore, #tpu.memory_space<semaphore_mem>> -> memref<!tpu.dma_semaphore, #tpu.memory_space<semaphore_mem>>
    tpu.wait_dma2 semaphore(%7 : memref<!tpu.dma_semaphore, #tpu.memory_space<semaphore_mem>>) src(%4 : memref<2x1024xf32, #tpu.memory_space<any>>) dst(%5 : memref<2x1024xf32, #tpu.memory_space<any>>)
    return
  }
}

</mosaic_0001>

<bundles_post_ra>
// kernel: tpu_custom_call.1
= control target key start
LH: loop header
LB: loop body
LE: loop exit
PB: predicated region body
PF: predicated region fallthrough
CT: control target
= control target key end

     0   :  { %s35_s6 = smov [#allocation2]   ;;  %s36_s7 = smov [#allocation3]   ;;  %s54_s0 = inlined_call_operand.hbm [shape: f32[2,1024], index: 0, kind: input, shape index: {}]   ;;  %s55_s1 = inlined_call_operand.hbm [shape: f32[2,1024], index: 1, kind: output, shape index: {}]  }
   0x1   :  { %s37_s8 = smov 0  }
   0x2   :  { %18 = dma.general %s54_s0, 256, %s55_s1, %s35_s6, %s36_s7, [#allocation4], %s37_s8, 0  }
   0x3   :  { %33 = dma.done.wait [#allocation2], 256 }
   0x4   :  { %34 = vsyncadd [#allocation2], 4294967040 }
   0x5   :  { %23 = vsyncmov [#allocation2] }
   0x8   :  { %s24_s13 = vpop.sfrf %23 }
   0x9   :  { %p29_p0 = scmp.ne.s32.totalorder %s24_s13, 0 }
   0xb   :  { %28 = shalt.err (%p29_p0)  }

</bundles_post_ra>
